<compile_context>
chip_gen: v5e
topology: v5e:2x2
jax: 0.10.0
libtpu: 0.0.40
codegen_flags: <defaults>
</compile_context>

<pallas_src>
import functools

import jax
import jax.numpy as jnp
from jax import lax
from jax.experimental import pallas as pl
from jax.experimental.pallas import tpu as pltpu


def _round_up(x, m):
    return ((x + m - 1) // m) * m


# ----------------------------- Pallas kernel ------------------------------- #

def _conv_bn_relu_kernel(x_ref, w_ref, shift_ref, o_ref, patch_ref,
                         *, K, Wp, Cin_pad):
    """One image: relu( W @ im2col_vmem(x) + shift ).

    x_ref     : (Cin_pad, Lin_pad)        bf16 -- flattened, padded image
    w_ref     : (Cout_pad, K*K*Cin_pad)   bf16 -- BN-scale-folded weights
    shift_ref : (Cout_pad, 1)             f32  -- folded BN shift
    o_ref     : (Cout_pad, Lo_pad)        f32  -- output on padded-width grid
    patch_ref : (K*K*Cin_pad, Lo_pad)     bf16 -- VMEM scratch (im2col tile)
    """
    Lo = o_ref.shape[-1]

    # Build the patch matrix in VMEM: K*K sublane-aligned stores of static
    # lane-offset views of the resident input tile (no HBM im2col, no
    # per-tap accumulation).
    for kh in range(K):
        for kw in range(K):
            t = kh * K + kw
            d = kh * Wp + kw                           # static flat tap offset
            patch_ref[pl.ds(t * Cin_pad, Cin_pad), :] = x_ref[:, pl.ds(d, Lo)]

    # One MXU matmul over the full K*K*Cin_pad contraction depth.
    acc = jnp.dot(w_ref[...], patch_ref[...],
                  preferred_element_type=jnp.float32)
    o_ref[...] = jnp.maximum(acc + shift_ref[...], 0.0).astype(o_ref.dtype)


# ------------------------------ BasicConv ---------------------------------- #

def basic_conv_forward(x_nchw, conv_w, bn_gamma, bn_beta, bn_mean, bn_var,
                       *, stride=1, padding=1, eps=1e-5):
    """BasicConv forward: Conv2d(bias=False) -> BatchNorm2d(eval) -> ReLU.

    x_nchw : [N, Cin, H, W]
    conv_w : [Cout, Cin, K, K]   (PyTorch Conv2d layout)
    returns: [N, Cout, Ho, Wo]
    """
    assert stride == 1, "only stride=1 wired up here"
    N, Cin, H, W = x_nchw.shape
    Cout, _, K, _ = conv_w.shape
    Hp, Wp = H + 2 * padding, W + 2 * padding
    Ho, Wo = Hp - K + 1, Wp - K + 1

    # Channel padding to native TPU tiling (bf16 packs 16 rows per vreg
    # sublane group; f32 output wants multiples of 8 sublanes).
    Cin_pad = _round_up(Cin, 16)
    Cout_pad = _round_up(Cout, 8)

    # ---- fold BatchNorm (running stats) into scale/shift --------------------
    inv_std = lax.rsqrt(bn_var.astype(jnp.float32) + eps)
    scale = bn_gamma.astype(jnp.float32) * inv_std                   # (Cout,)
    shift = bn_beta.astype(jnp.float32) - bn_mean.astype(jnp.float32) * scale
    shift_p = jnp.pad(shift, (0, Cout_pad - Cout)).reshape(Cout_pad, 1)
    shift_p = shift_p.astype(jnp.float32)

    # Weights: fold scale, pad channels, lay out as (Cout_pad, K*K*Cin_pad)
    # with contraction index = (kh*K + kw) * Cin_pad + cin, matching the
    # in-kernel patch-matrix row order.
    w = conv_w.astype(jnp.float32) * scale[:, None, None, None]
    w = jnp.pad(w, ((0, Cout_pad - Cout), (0, Cin_pad - Cin), (0, 0), (0, 0)))
    w = jnp.transpose(w, (0, 2, 3, 1))            # (Cout_pad, K, K, Cin_pad)
    w = w.reshape(Cout_pad, K * K * Cin_pad).astype(jnp.bfloat16)

    # ---- input prep (cheap, no K*K blow-up in HBM) ---------------------------
    # Pad channels + spatial, flatten H*W (lane axis), pad flat length so every
    # tap's lane-offset window [d, d + Lo_pad) stays in bounds and lane extents
    # are multiples of 128.
    xp = jnp.pad(x_nchw, ((0, 0), (0, Cin_pad - Cin),
                          (padding, padding), (padding, padding)))
    Lo_pad = _round_up(Ho * Wp, 128)          # output flat length (padded-width grid)
    d_max = (K - 1) * (Wp + 1)                # largest tap offset
    Lin_pad = _round_up(Lo_pad + d_max, 128)
    xf = xp.reshape(N, Cin_pad, Hp * Wp).astype(jnp.bfloat16)
    xf = jnp.pad(xf, ((0, 0), (0, 0), (0, Lin_pad - Hp * Wp)))

    kernel = functools.partial(_conv_bn_relu_kernel, K=K, Wp=Wp,
                               Cin_pad=Cin_pad)
    flops = 2 * N * Cout_pad * (K * K * Cin_pad) * Lo_pad
    bytes_accessed = (xf.size * 2 + w.size * 2 + shift_p.size * 4
                      + N * Cout_pad * Lo_pad * 4)

    y = pl.pallas_call(
        kernel,
        out_shape=jax.ShapeDtypeStruct((N, Cout_pad, Lo_pad), jnp.float32),
        grid=(N,),
        in_specs=[
            pl.BlockSpec((None, Cin_pad, Lin_pad), lambda n: (n, 0, 0)),
            pl.BlockSpec((Cout_pad, K * K * Cin_pad), lambda n: (0, 0)),
            pl.BlockSpec((Cout_pad, 1), lambda n: (0, 0)),
        ],
        out_specs=pl.BlockSpec((None, Cout_pad, Lo_pad), lambda n: (n, 0, 0)),
        scratch_shapes=[pltpu.VMEM((K * K * Cin_pad, Lo_pad), jnp.bfloat16)],
        compiler_params=pltpu.CompilerParams(
            dimension_semantics=("parallel",)),
        cost_estimate=pl.CostEstimate(
            flops=flops, transcendentals=0, bytes_accessed=bytes_accessed),
    )(xf, w, shift_p)

    # Valid outputs live at flat index ho*Wp + wo (wo < Wo); drop the padded
    # output channels and the junk columns from the padded-width trick.
    out = y[:, :Cout, :Ho * Wp].reshape(N, Cout, Ho, Wp)[:, :, :, :Wo]
    return out


# ------------------------------ reference ---------------------------------- #

def basic_conv_reference(x_nchw, conv_w, bn_gamma, bn_beta, bn_mean, bn_var,
                         *, stride=1, padding=1, eps=1e-5):
    y = lax.conv_general_dilated(
        x_nchw, conv_w,
        window_strides=(stride, stride),
        padding=[(padding, padding), (padding, padding)],
        dimension_numbers=("NCHW", "OIHW", "NCHW"))
    inv_std = 1.0 / jnp.sqrt(bn_var + eps)
    scale = (bn_gamma * inv_std)[None, :, None, None]
    shift = (bn_beta - bn_mean * bn_gamma * inv_std)[None, :, None, None]
    return jnp.maximum(y * scale + shift, 0.0)


# --------------------------------- main ------------------------------------ #

if __name__ == "__main__":
    # BasicConv(in_planes=4, out_planes=8, kernel_size=3, stride=1, padding=1)
    N, Cin, H, W = 2, 4, 16, 16
    Cout, K = 8, 3

    key = jax.random.PRNGKey(0)
    kx, kw, kg, kb, km, kv = jax.random.split(key, 6)

    x = jax.random.normal(kx, (N, Cin, H, W), dtype=jnp.float32)
    conv_w = jax.random.normal(kw, (Cout, Cin, K, K), dtype=jnp.float32) * 0.1
    bn_gamma = 1.0 + 0.1 * jax.random.normal(kg, (Cout,), dtype=jnp.float32)
    bn_beta = 0.1 * jax.random.normal(kb, (Cout,), dtype=jnp.float32)
    bn_mean = 0.05 * jax.random.normal(km, (Cout,), dtype=jnp.float32)
    bn_var = jnp.abs(1.0 + 0.1 * jax.random.normal(kv, (Cout,), dtype=jnp.float32))

    fwd = jax.jit(functools.partial(basic_conv_forward, stride=1, padding=1))
    out = jax.block_until_ready(fwd(x, conv_w, bn_gamma, bn_beta, bn_mean, bn_var))

    ref = basic_conv_reference(x, conv_w, bn_gamma, bn_beta, bn_mean, bn_var,
                               stride=1, padding=1)
    assert out.shape == (N, Cout, H, W), out.shape
    # bf16 matmul inputs -> loosened tolerance (f32 accumulation).
    assert jnp.allclose(out, ref, atol=3e-2, rtol=3e-2), float(
        jnp.max(jnp.abs(out - ref)))

    print("KERNEL_OK")
</pallas_src>

<mosaic_0001>
module attributes {stable_mosaic.version = 11 : i64} {
  func.func @_conv_bn_relu_kernel(%arg0: i32, %arg1: memref<1x16x512xbf16, #tpu.memory_space<vmem>>, %arg2: memref<8x144xbf16, #tpu.memory_space<vmem>>, %arg3: memref<8x1xf32, #tpu.memory_space<vmem>>, %arg4: memref<1x8x384xf32, #tpu.memory_space<vmem>>, %arg5: memref<144x384xbf16, #tpu.memory_space<vmem>>) attributes {dimension_semantics = [#tpu.dimension_semantics<parallel>], iteration_bounds = array<i64: 2>, scalar_prefetch = 0 : i64, scratch_operands = 1 : i64, tpu.core_type = #tpu.core_type<tc>, window_params = [{transform_indices = @transform_0, window_bounds = array<i64: 1, 16, 512>}, {pipeline_mode = #tpu.pipeline_mode<synchronous>, transform_indices = @transform_1, window_bounds = array<i64: 8, 144>}, {pipeline_mode = #tpu.pipeline_mode<synchronous>, transform_indices = @transform_2, window_bounds = array<i64: 8, 1>}, {transform_indices = @transform_3, window_bounds = array<i64: 1, 8, 384>}]} {
    %c0 = arith.constant 0 : index
    %c0_0 = arith.constant 0 : index
    %c0_1 = arith.constant 0 : index
    %0 = vector.load %arg1[%c0, %c0_0, %c0_1] : memref<1x16x512xbf16, #tpu.memory_space<vmem>>, vector<1x16x384xbf16>
    %1 = vector.shape_cast %0 : vector<1x16x384xbf16> to vector<16x384xbf16>
    %c0_2 = arith.constant 0 : index
    %c0_3 = arith.constant 0 : index
    %2 = vector.load %arg5[%c0_2, %c0_3] : memref<144x384xbf16, #tpu.memory_space<vmem>>, vector<16x384xbf16>
    tpu.vector_store %arg5[%c0_2, %c0_3], %1 {strides = array<i32>} : memref<144x384xbf16, #tpu.memory_space<vmem>>, vector<16x384xbf16>,
    %c0_4 = arith.constant 0 : index
    %c0_5 = arith.constant 0 : index
    %c1 = arith.constant 1 : index
    %3 = vector.load %arg1[%c0_4, %c0_5, %c1] : memref<1x16x512xbf16, #tpu.memory_space<vmem>>, vector<1x16x384xbf16>
    %4 = vector.shape_cast %3 : vector<1x16x384xbf16> to vector<16x384xbf16>
    %c16 = arith.constant 16 : index
    %c0_6 = arith.constant 0 : index
    %5 = vector.load %arg5[%c16, %c0_6] : memref<144x384xbf16, #tpu.memory_space<vmem>>, vector<16x384xbf16>
    tpu.vector_store %arg5[%c16, %c0_6], %4 {strides = array<i32>} : memref<144x384xbf16, #tpu.memory_space<vmem>>, vector<16x384xbf16>,
    %c0_7 = arith.constant 0 : index
    %c0_8 = arith.constant 0 : index
    %c2 = arith.constant 2 : index
    %6 = vector.load %arg1[%c0_7, %c0_8, %c2] : memref<1x16x512xbf16, #tpu.memory_space<vmem>>, vector<1x16x384xbf16>
    %7 = vector.shape_cast %6 : vector<1x16x384xbf16> to vector<16x384xbf16>
    %c32 = arith.constant 32 : index
    %c0_9 = arith.constant 0 : index
    %8 = vector.load %arg5[%c32, %c0_9] : memref<144x384xbf16, #tpu.memory_space<vmem>>, vector<16x384xbf16>
    tpu.vector_store %arg5[%c32, %c0_9], %7 {strides = array<i32>} : memref<144x384xbf16, #tpu.memory_space<vmem>>, vector<16x384xbf16>,
    %c0_10 = arith.constant 0 : index
    %c0_11 = arith.constant 0 : index
    %c18 = arith.constant 18 : index
    %9 = vector.load %arg1[%c0_10, %c0_11, %c18] : memref<1x16x512xbf16, #tpu.memory_space<vmem>>, vector<1x16x384xbf16>
    %10 = vector.shape_cast %9 : vector<1x16x384xbf16> to vector<16x384xbf16>
    %c48 = arith.constant 48 : index
    %c0_12 = arith.constant 0 : index
    %11 = vector.load %arg5[%c48, %c0_12] : memref<144x384xbf16, #tpu.memory_space<vmem>>, vector<16x384xbf16>
    tpu.vector_store %arg5[%c48, %c0_12], %10 {strides = array<i32>} : memref<144x384xbf16, #tpu.memory_space<vmem>>, vector<16x384xbf16>,
    %c0_13 = arith.constant 0 : index
    %c0_14 = arith.constant 0 : index
    %c19 = arith.constant 19 : index
    %12 = vector.load %arg1[%c0_13, %c0_14, %c19] : memref<1x16x512xbf16, #tpu.memory_space<vmem>>, vector<1x16x384xbf16>
    %13 = vector.shape_cast %12 : vector<1x16x384xbf16> to vector<16x384xbf16>
    %c64 = arith.constant 64 : index
    %c0_15 = arith.constant 0 : index
    %14 = vector.load %arg5[%c64, %c0_15] : memref<144x384xbf16, #tpu.memory_space<vmem>>, vector<16x384xbf16>
    tpu.vector_store %arg5[%c64, %c0_15], %13 {strides = array<i32>} : memref<144x384xbf16, #tpu.memory_space<vmem>>, vector<16x384xbf16>,
    %c0_16 = arith.constant 0 : index
    %c0_17 = arith.constant 0 : index
    %c20 = arith.constant 20 : index
    %15 = vector.load %arg1[%c0_16, %c0_17, %c20] : memref<1x16x512xbf16, #tpu.memory_space<vmem>>, vector<1x16x384xbf16>
    %16 = vector.shape_cast %15 : vector<1x16x384xbf16> to vector<16x384xbf16>
    %c80 = arith.constant 80 : index
    %c0_18 = arith.constant 0 : index
    %17 = vector.load %arg5[%c80, %c0_18] : memref<144x384xbf16, #tpu.memory_space<vmem>>, vector<16x384xbf16>
    tpu.vector_store %arg5[%c80, %c0_18], %16 {strides = array<i32>} : memref<144x384xbf16, #tpu.memory_space<vmem>>, vector<16x384xbf16>,
    %c0_19 = arith.constant 0 : index
    %c0_20 = arith.constant 0 : index
    %c36 = arith.constant 36 : index
    %18 = vector.load %arg1[%c0_19, %c0_20, %c36] : memref<1x16x512xbf16, #tpu.memory_space<vmem>>, vector<1x16x384xbf16>
    %19 = vector.shape_cast %18 : vector<1x16x384xbf16> to vector<16x384xbf16>
    %c96 = arith.constant 96 : index
    %c0_21 = arith.constant 0 : index
    %20 = vector.load %arg5[%c96, %c0_21] : memref<144x384xbf16, #tpu.memory_space<vmem>>, vector<16x384xbf16>
    tpu.vector_store %arg5[%c96, %c0_21], %19 {strides = array<i32>} : memref<144x384xbf16, #tpu.memory_space<vmem>>, vector<16x384xbf16>,
    %c0_22 = arith.constant 0 : index
    %c0_23 = arith.constant 0 : index
    %c37 = arith.constant 37 : index
    %21 = vector.load %arg1[%c0_22, %c0_23, %c37] : memref<1x16x512xbf16, #tpu.memory_space<vmem>>, vector<1x16x384xbf16>
    %22 = vector.shape_cast %21 : vector<1x16x384xbf16> to vector<16x384xbf16>
    %c112 = arith.constant 112 : index
    %c0_24 = arith.constant 0 : index
    %23 = vector.load %arg5[%c112, %c0_24] : memref<144x384xbf16, #tpu.memory_space<vmem>>, vector<16x384xbf16>
    tpu.vector_store %arg5[%c112, %c0_24], %22 {strides = array<i32>} : memref<144x384xbf16, #tpu.memory_space<vmem>>, vector<16x384xbf16>,
    %c0_25 = arith.constant 0 : index
    %c0_26 = arith.constant 0 : index
    %c38 = arith.constant 38 : index
    %24 = vector.load %arg1[%c0_25, %c0_26, %c38] : memref<1x16x512xbf16, #tpu.memory_space<vmem>>, vector<1x16x384xbf16>
    %25 = vector.shape_cast %24 : vector<1x16x384xbf16> to vector<16x384xbf16>
    %c128 = arith.constant 128 : index
    %c0_27 = arith.constant 0 : index
    %26 = vector.load %arg5[%c128, %c0_27] : memref<144x384xbf16, #tpu.memory_space<vmem>>, vector<16x384xbf16>
    tpu.vector_store %arg5[%c128, %c0_27], %25 {strides = array<i32>} : memref<144x384xbf16, #tpu.memory_space<vmem>>, vector<16x384xbf16>,
    %c0_28 = arith.constant 0 : index
    %c0_29 = arith.constant 0 : index
    %27 = vector.load %arg2[%c0_28, %c0_29] : memref<8x144xbf16, #tpu.memory_space<vmem>>, vector<8x144xbf16>
    %c0_30 = arith.constant 0 : index
    %c0_31 = arith.constant 0 : index
    %28 = vector.load %arg5[%c0_30, %c0_31] : memref<144x384xbf16, #tpu.memory_space<vmem>>, vector<144x384xbf16>
    %cst = arith.constant dense<0.000000e+00> : vector<8x384xf32>
    %29 = tpu.matmul %27, %28, %cst {dimension_numbers = #tpu.dot_dimension_numbers<[1], [0], [0], [1], [0, 0, 1, 1], [], []>} : vector<8x144xbf16>, vector<144x384xbf16>, vector<8x384xf32> -> vector<8x384xf32>
    %c0_32 = arith.constant 0 : index
    %c0_33 = arith.constant 0 : index
    %30 = vector.load %arg3[%c0_32, %c0_33] : memref<8x1xf32, #tpu.memory_space<vmem>>, vector<8x1xf32>
    %31 = vector.broadcast %30 : vector<8x1xf32> to vector<8x384xf32>
    %32 = arith.addf %29, %31 : vector<8x384xf32>
    %cst_34 = arith.constant 0.000000e+00 : f32
    %33 = vector.broadcast %cst_34 : f32 to vector<8x384xf32>
    %34 = arith.maximumf %32, %33 : vector<8x384xf32>
    %c0_35 = arith.constant 0 : index
    %c0_36 = arith.constant 0 : index
    %c0_37 = arith.constant 0 : index
    %35 = vector.load %arg4[%c0_35, %c0_36, %c0_37] : memref<1x8x384xf32, #tpu.memory_space<vmem>>, vector<1x8x384xf32>
    %36 = vector.shape_cast %35 : vector<1x8x384xf32> to vector<8x384xf32>
    %37 = vector.shape_cast %34 : vector<8x384xf32> to vector<1x8x384xf32>
    tpu.vector_store %arg4[%c0_35, %c0_36, %c0_37], %37 {strides = array<i32>} : memref<1x8x384xf32, #tpu.memory_space<vmem>>, vector<1x8x384xf32>,
    return
  }
  func.func @transform_0(%arg0: i32) -> (i32, i32, i32) {
    %c0_i32 = arith.constant 0 : i32
    %c0_i32_0 = arith.constant 0 : i32
    %c0_i32_1 = arith.constant 0 : i32
    return %arg0, %c0_i32, %c0_i32_0 : i32, i32, i32
  }
  func.func @transform_1(%arg0: i32) -> (i32, i32) {
    %c0_i32 = arith.constant 0 : i32
    %c0_i32_0 = arith.constant 0 : i32
    %c0_i32_1 = arith.constant 0 : i32
    return %c0_i32, %c0_i32_0 : i32, i32
  }
  func.func @transform_2(%arg0: i32) -> (i32, i32) {
    %c0_i32 = arith.constant 0 : i32
    %c0_i32_0 = arith.constant 0 : i32
    %c0_i32_1 = arith.constant 0 : i32
    return %c0_i32, %c0_i32_0 : i32, i32
  }
  func.func @transform_3(%arg0: i32) -> (i32, i32, i32) {
    %c0_i32 = arith.constant 0 : i32
    %c0_i32_0 = arith.constant 0 : i32
    %c0_i32_1 = arith.constant 0 : i32
    return %arg0, %c0_i32, %c0_i32_0 : i32, i32, i32
  }
}

</mosaic_0001>

<bundles_post_ra>
// kernel: basic_conv_forward.1
= control target key start
LH: loop header
LB: loop body
LE: loop exit
PB: predicated region body
PF: predicated region fallthrough
CT: control target
= control target key end

     0   :  { %s1003_s12 = smov 0   ;;  %s1130_s0 = inlined_call_operand.vmem [shape: bf16[2,16,512], index: 0, kind: input, shape index: {}]   ;;  %s1131_s1 = inlined_call_operand.vmem [shape: bf16[8,144], index: 1, kind: input, shape index: {}]   ;;  %s1132_s2 = inlined_call_operand.vmem [shape: f32[8,1], index: 2, kind: input, shape index: {}]   ;;  %s1133_s3 = inlined_call_operand.vmem [shape: f32[2,8,384], index: 3, kind: output, shape index: {}]  }
   0x1 LB: > { %s797_s13 = sadd.s32 4294967295, %s972_s12   ;;  %p801_p0 = scmp.ge.s32.totalorder %s972_s12, 1  ;;  %s972_s12 = sphi %s1003_s12, %s13_s12  }
   0x2   : > { %p137_p1 = scmp.lt.s32.totalorder %s972_s12, 3 }
   0x4   : > { %p138_p2 = pnand %p801_p0, %p137_p1 }
   0x5   : > { %p161_p3 = scmp.lt.s32.totalorder (!%p138_p2), %s797_s13, 1  ;;  %s974_s18 = smov (!%p138_p2), 91  }
   0x6   : > { %141 = sbr.rel (%p138_p2) target bundleno = 371 (0x173), region = 32  ;;  %s975_s19 = smov (!%p138_p2), 92  }
   0x7   : > { %s976_s20 = smov (!%p138_p2), 108   ;;  %s977_s21 = smov (!%p138_p2), 109  }
   0x8   : > { %s978_s22 = smov (!%p138_p2), 90   ;;  %s979_s23 = smov (!%p138_p2), 110  }
   0x9   : > { %s980_s24 = smov (!%p138_p2), 126   ;;  %s981_s25 = smov (!%p138_p2), 127  }
   0xb   : > { %s1135_s13 = smov (!%p161_p3, %s797_s13), 1  ;;  %vm200_vm0 = vcmask 1043456   ;;  %vm377_vm1 = vcmask 752640   ;;  %vm342_vm2 = vcmask 883712   ;;  %vm412_vm3 = vcmask 744448  }
   0xc   : > { %s918_s14 = sshll.u32 %s1135_s13, 5  ;;  %vm447_vm4 = vcmask 736256   ;;  %vm307_vm5 = vcmask 891904   ;;  %vm272_vm6 = vcmask 900096   ;;  %vm202_vm7 = vcmask 1039360   ;;  %s946_s30 = smul.u32 24, %s1135_s13 }
   0xd   : > { %s1017_s17 = scalar_lea.vmem %s1130_s0, %s918_s14  ;;  %vm654_vm8 = vcmask 130048   ;;  %vm237_vm9 = vcmask 1031168  }
   0xe   : > { %v393_v0 = vld [vmem:[%s1017_s17 + $0x10] sm:$0xff]  ;;  %v391_v1 = vld [vmem:[%s1017_s17] sm:$0xff]  ;;  %v394_v2 = vld [vmem:[%s1017_s17 + $0x18] sm:$0xff]  ;;  %s170_s6 = scalar_lea.vmem %s1133_s3, %s946_s30 }
   0xf   : > { %403 = vrot.lane.b32.xlu1 %v393_v0, %s974_s18  ;;  %399 = vrot.lane.b32.xlu0 %v391_v1, %s974_s18  ;;  %176 = vst [vmem:[#allocation2] sm:$0xff] %v391_v1  ;;  %v392_v3 = vld [vmem:[%s1017_s17 + $0x8] sm:$0xff] }
  0x10   : > { %364 = vrot.lane.b32.xlu2 %v391_v1, %s975_s19  ;;  %178 = vst [vmem:[#allocation2 + $0xc] sm:$0xff] %v393_v0 }
  0x17   : > { %405 = vrot.lane.b32.xlu1 %v394_v2, %s974_s18  ;;  %401 = vrot.lane.b32.xlu0 %v392_v3, %s974_s18 }
  0x18   : > { %366 = vrot.lane.b32.xlu2 %v392_v3, %s975_s19 }
  0x1f   : > { %370 = vrot.lane.b32.xlu1 %v394_v2, %s975_s19  ;;  %368 = vrot.lane.b32.xlu0 %v393_v0, %s975_s19 }
  0x20   : > { %329 = vrot.lane.b32.xlu2 %v391_v1, %s976_s20 }
  0x27   : > { %333 = vrot.lane.b32.xlu1 %v393_v0, %s976_s20  ;;  %331 = vrot.lane.b32.xlu0 %v392_v3, %s976_s20 }
  0x28   : > { %335 = vrot.lane.b32.xlu2 %v394_v2, %s976_s20 }
  0x2f   : > { %296 = vrot.lane.b32.xlu1 %v392_v3, %s977_s21  ;;  %294 = vrot.lane.b32.xlu0 %v391_v1, %s977_s21 }
  0x30   : > { %298 = vrot.lane.b32.xlu2 %v393_v0, %s977_s21 }
  0x37   : > { %434 = vrot.lane.b32.xlu1 %v391_v1, %s978_s22  ;;  %300 = vrot.lane.b32.xlu0 %v394_v2, %s977_s21 }
  0x38   : > { %436 = vrot.lane.b32.xlu2 %v392_v3, %s978_s22 }
  0x3f   : > { %440 = vrot.lane.b32.xlu1 %v394_v2, %s978_s22  ;;  %438 = vrot.lane.b32.xlu0 %v393_v0, %s978_s22 }
  0x40   : > { %259 = vrot.lane.b32.xlu2 %v391_v1, %s979_s23 }
  0x47   : > { %263 = vrot.lane.b32.xlu1 %v393_v0, %s979_s23  ;;  %261 = vrot.lane.b32.xlu0 %v392_v3, %s979_s23 }
  0x48   : > { %265 = vrot.lane.b32.xlu2 %v394_v2, %s979_s23 }
  0x4f   : > { %226 = vrot.lane.b32.xlu1 %v392_v3, %s980_s24  ;;  %224 = vrot.lane.b32.xlu0 %v391_v1, %s980_s24 }
  0x50   : > { %228 = vrot.lane.b32.xlu2 %v393_v0, %s980_s24 }
  0x57   : > { %230 = vrot.lane.b32.xlu0 %v394_v2, %s980_s24  ;;  %188 = vrot.lane.b32.xlu1 %v391_v1, %s981_s25 }
  0x58   : > { %190 = vrot.lane.b32.xlu2 %v392_v3, %s981_s25 }
  0x5f   : > { %192 = vrot.lane.b32.xlu0 %v393_v0, %s981_s25  ;;  %194 = vrot.lane.b32.xlu1 %v394_v2, %s981_s25 }
  0x6a   : > { %v365_v4 = vpop.permute.xlu2 %364 }
  0x6b   : > { %v372_v5 = vrot.slane %v365_v4, 4 }
  0x72   : > { %v367_v6 = vpop.permute.xlu2 %366 }
  0x73   : > { %v373_v7 = vrot.slane %v367_v6, 4 }
  0x75   : > { %v376_v8 = vsel %vm200_vm0, %v372_v5, %v373_v7  ;;  %v379_v9 = vsel %vm377_vm1, %v367_v6, %v373_v7 }
  0x76   : > { %v378_v10 = vsel %vm377_vm1, %v365_v4, %v376_v8  ;;  %388 = vst [vmem:[#allocation2 + $0x98] sm:$0xf] %v379_v9 }
  0x77   : > { %387 = vst [vmem:[#allocation2 + $0x90] sm:$0xff] %v378_v10 }
  0x7a   : > { %v330_v11 = vpop.permute.xlu2 %329 }
  0x7b   : > { %v337_v46 = vrot.slane %v330_v11, 4 }
  0x7e   : > { %v879_v55 = vld [vmem:[#allocation2 + $0x90] sm:$0xf]  ;;  %v937_v56 = vld [vmem:[#allocation2 + $0x94] sm:$0xf] }
  0x81   : > { %v404_v12 = vpop.permute.xlu1 %403  ;;  %v400_v13 = vpop.permute.xlu0 %399 }
  0x82   : > { %v336_v14 = vpop.permute.xlu2 %335  ;;  %v409_v19 = vrot.slane %v404_v12, 4  ;;  %v407_v20 = vrot.slane %v400_v13, 4 }
  0x83   : > { %v340_v15 = vrot.slane %v336_v14, 4 }
  0x85   : > { %v347_v16 = vsel %vm342_vm2, %v336_v14, %v340_v15 }
  0x86   : > { %355 = vst [vmem:[#allocation2 + $0x8c] sm:$0xf] %v347_v16 }
  0x89   : > { %v406_v17 = vpop.permute.xlu1 %405  ;;  %v402_v18 = vpop.permute.xlu0 %401 }
  0x8a   : > { %v410_v21 = vrot.slane %v406_v17, 4  ;;  %v408_v22 = vrot.slane %v402_v18, 4  ;;  %v1027_v23 = vpop.permute.xlu2 %298 }
  0x8c   : > { %v415_v24 = vsel %vm200_vm0, %v409_v19, %v410_v21  ;;  %v417_v25 = vsel %vm412_vm3, %v406_v17, %v410_v21  ;;  %v411_v26 = vsel %vm200_vm0, %v407_v20, %v408_v22  ;;  %v414_v29 = vsel %vm412_vm3, %v402_v18, %v408_v22 }
  0x8d   : > { %v416_v27 = vsel %vm412_vm3, %v404_v12, %v415_v24  ;;  %425 = vst [vmem:[#allocation2 + $0xbc] sm:$0xf] %v417_v25  ;;  %v413_v28 = vsel %vm412_vm3, %v400_v13, %v411_v26 }
  0x8e   : > { %424 = vst [vmem:[#allocation2 + $0xb4] sm:$0xff] %v416_v27 }
  0x8f   : > { %422 = vst [vmem:[#allocation2 + $0xa8] sm:$0xff] %v413_v28 }
  0x90   : > { %423 = vst [vmem:[#allocation2 + $0xb0] sm:$0xf] %v414_v29 }
  0x91   : > { %v371_v30 = vpop.permute.xlu1 %370  ;;  %v369_v31 = vpop.permute.xlu0 %368 }
  0x92   : > { %v375_v32 = vrot.slane %v371_v30, 4  ;;  %v374_v33 = vrot.slane %v369_v31, 4  ;;  %v1031_v34 = vpop.permute.xlu2 %436 }
  0x93   : > { %v443_v35 = vrot.slane %v1031_v34, 4 }
  0x94   : > { %v382_v36 = vsel %vm377_vm1, %v371_v30, %v375_v32  ;;  %v380_v37 = vsel %vm200_vm0, %v374_v33, %v375_v32 }
  0x95   : > { %390 = vst [vmem:[#allocation2 + $0xa4] sm:$0xf] %v382_v36  ;;  %v381_v38 = vsel %vm377_vm1, %v369_v31, %v380_v37  ;;  %v941_v39 = vld [vmem:[#allocation2 + $0xb0] sm:$0xf0]  ;;  %v893_v40 = vld [vmem:[#allocation2 + $0xb4] sm:$0xf0]  ;;  %v449_v41 = vsel %vm447_vm4, %v1031_v34, %v443_v35 }
  0x96   : > { %389 = vst [vmem:[#allocation2 + $0x9c] sm:$0xff] %v381_v38  ;;  %v891_v42 = vld [vmem:[#allocation2 + $0xa8] sm:$0xf]  ;;  %v940_v43 = vld [vmem:[#allocation2 + $0xac] sm:$0xf] }
  0x97   : > { %v892_v44 = vor.u32 %v941_v39, %v891_v42  ;;  %v896_v45 = vor.u32 %v940_v43, %v893_v40  ;;  %458 = vst [vmem:[#allocation2 + $0xc8] sm:$0xf] %v449_v41  ;;  %v1083_v43 = vld [vmem:[%s1131_s1] sm:$0xff] }
  0x99   : > { %658 = vmatpush.bf16.msra.mxu0 %v892_v44  ;;  %684 = vmatpush.bf16.msra.mxu2 %v896_v45  ;;  %v334_v47 = vpop.permute.xlu1 %333  ;;  %v332_v48 = vpop.permute.xlu0 %331 }
  0x9a   : > { %v339_v49 = vrot.slane %v334_v47, 4  ;;  %v338_v50 = vrot.slane %v332_v48, 4  ;;  %v1041_v51 = vpop.permute.xlu2 %259 }
  0x9b   : > { %v267_v42 = vrot.slane %v1041_v51, 4 }
  0x9c   : > { %v341_v52 = vsel %vm200_vm0, %v337_v46, %v338_v50  ;;  %v344_v53 = vsel %vm342_vm2, %v332_v48, %v338_v50  ;;  %v345_v54 = vsel %vm200_vm0, %v339_v49, %v340_v15  ;;  %v304_v15 = vrot.slane %v1027_v23, 4  ;;  %v899_v48 = vld [vmem:[#allocation2 + $0xb0] sm:$0xf]  ;;  %v942_v49 = vld [vmem:[#allocation2 + $0xb8] sm:$0xf0] }
  0x9d   : > { %v343_v57 = vsel %vm342_vm2, %v330_v11, %v341_v52  ;;  %353 = vst [vmem:[#allocation2 + $0x80] sm:$0xf] %v344_v53  ;;  %v346_v58 = vsel %vm342_vm2, %v334_v47, %v345_v54  ;;  %v938_v59 = vld [vmem:[#allocation2 + $0x98] sm:$0xf0]  ;;  %v881_v60 = vld [vmem:[#allocation2 + $0x9c] sm:$0xf0]  ;;  %v506_v53 = vunpack.c.h.b16 %v1083_v43 }
  0x9e   : > { %352 = vst [vmem:[#allocation2 + $0x78] sm:$0xff] %v343_v57  ;;  %v880_v61 = vor.u32 %v938_v59, %v879_v55  ;;  %v884_v62 = vor.u32 %v937_v56, %v881_v60  ;;  %v173_v54 = vld [vmem:[%s1017_s17 + $0x8] sm:$0xf]  ;;  %v175_v59 = vld [vmem:[%s1017_s17 + $0x18] sm:$0xf] }
  0x9f   : > { %354 = vst [vmem:[#allocation2 + $0x84] sm:$0xff] %v346_v58 }
  0xa0   : > { %659 = vmatpush.bf16.msra.mxu0 %v880_v61  ;;  %685 = vmatpush.bf16.msra.mxu2 %v884_v62  ;;  %177 = vst [vmem:[#allocation2 + $0x8] sm:$0xf] %v173_v54 }
  0xa1   : > { %v297_v63 = vpop.permute.xlu1 %296  ;;  %v295_v0 = vpop.permute.xlu0 %294  ;;  %179 = vst [vmem:[#allocation2 + $0x14] sm:$0xf] %v175_v59 }
  0xa2   : > { %v303_v1 = vrot.slane %v297_v63, 4  ;;  %v302_v2 = vrot.slane %v295_v0, 4  ;;  %v1048_v3 = vpop.permute.xlu2 %265 }
  0xa3   : > { %v270_v4 = vrot.slane %v1048_v3, 4 }
  0xa4   : > { %v309_v5 = vsel %vm307_vm5, %v297_v63, %v303_v1  ;;  %v306_v6 = vsel %vm200_vm0, %v302_v2, %v303_v1  ;;  %v911_v2 = vld [vmem:[#allocation2 + $0xc8] sm:$0xf] }
  0xa5   : > { %318 = vst [vmem:[#allocation2 + $0x68] sm:$0xf] %v309_v5  ;;  %v308_v7 = vsel %vm307_vm5, %v295_v0, %v306_v6  ;;  %v867_v8 = vld [vmem:[#allocation2 + $0x78] sm:$0xf]  ;;  %v934_v9 = vld [vmem:[#allocation2 + $0x7c] sm:$0xf]  ;;  %v277_v10 = vsel %vm272_vm6, %v1048_v3, %v270_v4  ;;  %v900_v5 = vor.u32 %v942_v49, %v899_v48  ;;  %v1096_v6 = vpack.c.b16 %v506_v53, %v506_v53 }
  0xa6   : > { %317 = vst [vmem:[#allocation2 + $0x60] sm:$0xff] %v308_v7  ;;  %v935_v11 = vld [vmem:[#allocation2 + $0x80] sm:$0xf0]  ;;  %v869_v12 = vld [vmem:[#allocation2 + $0x84] sm:$0xf0] }
  0xa7   : > { %v868_v13 = vor.u32 %v935_v11, %v867_v8  ;;  %v872_v14 = vor.u32 %v934_v9, %v869_v12  ;;  %285 = vst [vmem:[#allocation2 + $0x5c] sm:$0xf] %v277_v10  ;;  %v887_v10 = vld [vmem:[#allocation2 + $0x98] sm:$0xf] }
  0xa9   : > { %660 = vmatpush.bf16.msra.mxu0 %v868_v13  ;;  %686 = vmatpush.bf16.msra.mxu2 %v872_v14  ;;  %v435_v16 = vpop.permute.xlu1 %434  ;;  %v301_v17 = vpop.permute.xlu0 %300  ;;  %v875_v14 = vld [vmem:[#allocation2 + $0x80] sm:$0xf] }
  0xaa   : > { %v442_v18 = vrot.slane %v435_v16, 4  ;;  %v305_v19 = vrot.slane %v301_v17, 4  ;;  %v1059_v20 = vpop.permute.xlu2 %228 }
  0xac   : > { %v446_v21 = vsel %vm200_vm0, %v442_v18, %v443_v35  ;;  %v310_v22 = vsel %vm200_vm0, %v304_v15, %v305_v19  ;;  %v312_v24 = vsel %vm307_vm5, %v301_v17, %v305_v19  ;;  %v936_v15 = vld [vmem:[#allocation2 + $0x88] sm:$0xf0] }
  0xad   : > { %v448_v25 = vsel %vm447_vm4, %v435_v16, %v446_v21  ;;  %v311_v26 = vsel %vm307_vm5, %v1027_v23, %v310_v22  ;;  %320 = vst [vmem:[#allocation2 + $0x74] sm:$0xf] %v312_v24  ;;  %v855_v23 = vld [vmem:[#allocation2 + $0x60] sm:$0xf]  ;;  %v931_v36 = vld [vmem:[#allocation2 + $0x64] sm:$0xf] }
  0xae   : > { %457 = vst [vmem:[#allocation2 + $0xc0] sm:$0xff] %v448_v25  ;;  %v498_v25 = vld [vmem:[%s1132_s2] sm:$0xff] }
  0xaf   : > { %319 = vst [vmem:[#allocation2 + $0x6c] sm:$0xff] %v311_v26  ;;  %v234_v26 = vrot.slane %v1059_v20, 4 }
  0xb1   : > { %v441_v27 = vpop.permute.xlu1 %440  ;;  %v439_v28 = vpop.permute.xlu0 %438 }
  0xb2   : > { %v445_v29 = vrot.slane %v441_v27, 4  ;;  %v444_v30 = vrot.slane %v439_v28, 4  ;;  %v1069_v31 = vpop.permute.xlu2 %190 }
  0xb3   : > { %v197_v32 = vrot.slane %v1069_v31, 4 }
  0xb4   : > { %v452_v33 = vsel %vm447_vm4, %v441_v27, %v445_v29  ;;  %v450_v34 = vsel %vm200_vm0, %v444_v30, %v445_v29  ;;  %v876_v27 = vor.u32 %v936_v15, %v875_v14 }
  0xb5   : > { %460 = vst [vmem:[#allocation2 + $0xd4] sm:$0xf] %v452_v33  ;;  %v451_v35 = vsel %vm447_vm4, %v439_v28, %v450_v34  ;;  %v204_v37 = vsel %vm202_vm7, %v1069_v31, %v197_v32  ;;  %v903_v50 = vld [vmem:[#allocation2 + $0xc0] sm:$0xf]  ;;  %v943_v52 = vld [vmem:[#allocation2 + $0xc4] sm:$0xf] }
  0xb6   : > { %459 = vst [vmem:[#allocation2 + $0xcc] sm:$0xff] %v451_v35  ;;  %v932_v38 = vld [vmem:[#allocation2 + $0x68] sm:$0xf0]  ;;  %v857_v39 = vld [vmem:[#allocation2 + $0x6c] sm:$0xf0]  ;;  %v982_v28 = vmov 0  }
  0xb7   : > { %v856_v40 = vor.u32 %v932_v38, %v855_v23  ;;  %v860_v41 = vor.u32 %v931_v36, %v857_v39  ;;  %213 = vst [vmem:[#allocation2 + $0x20] sm:$0xf] %v204_v37  ;;  %964 = vset.pattern.permute.xlu2 %v982_v28  ;;  %965 = vset.pattern.permute.xlu0 %v982_v28  ;;  %v933_v33 = vld [vmem:[#allocation2 + $0x70] sm:$0xf0]  ;;  %v863_v23 = vld [vmem:[#allocation2 + $0x68] sm:$0xf] }
  0xb8   : > { %501 = vperm.xlu2 %964, %v498_v25   ;;  %v864_v39 = vor.u32 %v933_v33, %v863_v23 }
  0xb9   : > { %661 = vmatpush.bf16.msra.mxu0 %v856_v40  ;;  %687 = vmatpush.bf16.msra.mxu2 %v860_v41  ;;  %v264_v44 = vpop.permute.xlu1 %263  ;;  %v262_v45 = vpop.permute.xlu0 %261 }
  0xba   : > { %v269_v46 = vrot.slane %v264_v44, 4  ;;  %v268_v47 = vrot.slane %v262_v45, 4 }
  0xbc   : > { %v271_v55 = vsel %vm200_vm0, %v267_v42, %v268_v47  ;;  %v274_v56 = vsel %vm272_vm6, %v262_v45, %v268_v47  ;;  %v275_v57 = vsel %vm200_vm0, %v269_v46, %v270_v4  ;;  %v945_v58 = vld [vmem:[#allocation2 + $0xd0] sm:$0xf0]  ;;  %v939_v4 = vld [vmem:[#allocation2 + $0xa0] sm:$0xf0] }
  0xbd   : > { %v273_v60 = vsel %vm272_vm6, %v1041_v51, %v271_v55  ;;  %283 = vst [vmem:[#allocation2 + $0x50] sm:$0xf] %v274_v56  ;;  %v276_v61 = vsel %vm272_vm6, %v264_v44, %v275_v57  ;;  %v944_v62 = vld [vmem:[#allocation2 + $0xc8] sm:$0xf0]  ;;  %v905_v63 = vld [vmem:[#allocation2 + $0xcc] sm:$0xf0]  ;;  %v912_v3 = vor.u32 %v945_v58, %v911_v2  ;;  %v888_v11 = vor.u32 %v939_v4, %v887_v10 }
  0xbe   : > { %282 = vst [vmem:[#allocation2 + $0x48] sm:$0xff] %v273_v60  ;;  %v904_v0 = vor.u32 %v944_v62, %v903_v50  ;;  %v908_v1 = vor.u32 %v943_v52, %v905_v63  ;;  %v930_v44 = vld [vmem:[#allocation2 + $0x58] sm:$0xf0]  ;;  %v827_v60 = vld [vmem:[#allocation2 + $0x20] sm:$0xf]  ;;  %v505_v10 = vunpack.c.l.b16 %v1083_v43 }
  0xbf   : > { %284 = vst [vmem:[#allocation2 + $0x54] sm:$0xff] %v276_v61  ;;  %v815_v61 = vld [vmem:[#allocation2 + $0x8] sm:$0xf]  ;;  %v807_v62 = vld [vmem:[#allocation2] sm:$0xf] }
  0xc0   : > { %678 = vmatpush.bf16.msra.mxu1 %v904_v0  ;;  %704 = vmatpush.bf16.msra.mxu3 %v908_v1  ;;  %v920_v63 = vld [vmem:[#allocation2 + $0x8] sm:$0xf0]  ;;  %v919_v0 = vld [vmem:[#allocation2 + $0x4] sm:$0xf]  ;;  %v809_v1 = vld [vmem:[#allocation2 + $0xc] sm:$0xf0]  ;;  %v507_v14 = vpack.c.b16 %v505_v10, %v505_v10 }
  0xc1   : > { %v227_v51 = vpop.permute.xlu1 %226  ;;  %v225_v7 = vpop.permute.xlu0 %224 }
  0xc2   : > { %v233_v8 = vrot.slane %v227_v51, 4  ;;  %v232_v9 = vrot.slane %v225_v7, 4 }
  0xc3   : > { %914 = vmatmul.msk.bf16.vlgmr.msra.gmra.mxu3 %vm654_vm8, %v1096_v6  ;;  %913 = vmatmul.msk.bf16.vlgmr.msra.gmra.mxu1 %vm654_vm8, %v1096_v6 }
  0xc4   : > { %710 = vmatpush.bf16.msrb.mxu1 %v900_v5  ;;  %730 = vmatpush.bf16.msrb.mxu3 %v912_v3  ;;  %v239_v12 = vsel %vm237_vm9, %v227_v51, %v233_v8  ;;  %v236_v13 = vsel %vm200_vm0, %v232_v9, %v233_v8  ;;  %v851_v42 = vld [vmem:[#allocation2 + $0x50] sm:$0xf]  ;;  %v921_v3 = vld [vmem:[#allocation2 + $0x10] sm:$0xf0] }
  0xc5   : > { %248 = vst [vmem:[#allocation2 + $0x38] sm:$0xf] %v239_v12  ;;  %v238_v16 = vsel %vm237_vm9, %v225_v7, %v236_v13  ;;  %v843_v17 = vld [vmem:[#allocation2 + $0x48] sm:$0xf]  ;;  %v928_v18 = vld [vmem:[#allocation2 + $0x4c] sm:$0xf]  ;;  %v852_v45 = vor.u32 %v930_v44, %v851_v42  ;;  %v808_v12 = vor.u32 %v920_v63, %v807_v62  ;;  %v812_v13 = vor.u32 %v919_v0, %v809_v1 }
  0xc6   : > { %247 = vst [vmem:[#allocation2 + $0x30] sm:$0xff] %v238_v16  ;;  %v929_v19 = vld [vmem:[#allocation2 + $0x50] sm:$0xf0]  ;;  %v845_v21 = vld [vmem:[#allocation2 + $0x54] sm:$0xf0] }
  0xc7   : > { %v844_v22 = vor.u32 %v929_v19, %v843_v17  ;;  %v848_v24 = vor.u32 %v928_v18, %v845_v21 }
  0xc8   : > { %711 = vmatpush.bf16.msrb.mxu1 %v888_v11  ;;  %v816_v11 = vor.u32 %v921_v3, %v815_v61 }
  0xc9   : > { %662 = vmatpush.bf16.msra.mxu0 %v844_v22  ;;  %688 = vmatpush.bf16.msra.mxu2 %v848_v24  ;;  %v231_v29 = vpop.permute.xlu0 %230  ;;  %v189_v30 = vpop.permute.xlu1 %188 }
  0xca   : > { %v235_v34 = vrot.slane %v231_v29, 4  ;;  %v196_v35 = vrot.slane %v189_v30, 4 }
  0xcc   : > { %712 = vmatpush.bf16.msrb.mxu1 %v876_v27  ;;  %v240_v36 = vsel %vm200_vm0, %v234_v26, %v235_v34  ;;  %v242_v37 = vsel %vm237_vm9, %v231_v29, %v235_v34  ;;  %v201_v38 = vsel %vm200_vm0, %v196_v35, %v197_v32  ;;  %v839_v49 = vld [vmem:[#allocation2 + $0x38] sm:$0xf] }
  0xcd   : > { %v241_v40 = vsel %vm237_vm9, %v1059_v20, %v240_v36  ;;  %250 = vst [vmem:[#allocation2 + $0x44] sm:$0xf] %v242_v37  ;;  %v203_v41 = vsel %vm202_vm7, %v189_v30, %v201_v38  ;;  %v831_v52 = vld [vmem:[#allocation2 + $0x30] sm:$0xf]  ;;  %v925_v53 = vld [vmem:[#allocation2 + $0x34] sm:$0xf] }
  0xce   : > { %249 = vst [vmem:[#allocation2 + $0x3c] sm:$0xff] %v241_v40 }
  0xcf   : > { %212 = vst [vmem:[#allocation2 + $0x18] sm:$0xff] %v203_v41 }
  0xd0   : > { %713 = vmatpush.bf16.msrb.mxu1 %v864_v39 }
  0xd1   : > { %v193_v46 = vpop.permute.xlu0 %192  ;;  %v195_v47 = vpop.permute.xlu1 %194 }
  0xd2   : > { %v198_v48 = vrot.slane %v193_v46, 4  ;;  %v199_v31 = vrot.slane %v195_v47, 4 }
  0xd3   : > { %915 = vmatmul.msk.bf16.vlgmr.msrb.gmra.mxu3 %vm654_vm8, %v1096_v6 }
  0xd4   : > { %714 = vmatpush.bf16.msrb.mxu1 %v852_v45  ;;  %v205_v20 = vsel %vm200_vm0, %v198_v48, %v199_v31  ;;  %v207_v32 = vsel %vm202_vm7, %v195_v47, %v199_v31  ;;  %v927_v50 = vld [vmem:[#allocation2 + $0x40] sm:$0xf0] }
  0xd5   : > { %v206_v54 = vsel %vm202_vm7, %v193_v46, %v205_v20  ;;  %215 = vst [vmem:[#allocation2 + $0x2c] sm:$0xf] %v207_v32  ;;  %v840_v55 = vor.u32 %v927_v50, %v839_v49  ;;  %v926_v56 = vld [vmem:[#allocation2 + $0x38] sm:$0xf0]  ;;  %v833_v57 = vld [vmem:[#allocation2 + $0x3c] sm:$0xf0] }
  0xd6   : > { %214 = vst [vmem:[#allocation2 + $0x24] sm:$0xff] %v206_v54  ;;  %v832_v58 = vor.u32 %v926_v56, %v831_v52  ;;  %v836_v59 = vor.u32 %v925_v53, %v833_v57  ;;  %v819_v5 = vld [vmem:[#allocation2 + $0x18] sm:$0xf]  ;;  %v922_v51 = vld [vmem:[#allocation2 + $0x1c] sm:$0xf] }
  0xd8   : > { %715 = vmatpush.bf16.msrb.mxu1 %v840_v55  ;;  %663 = vmatpush.bf16.msra.mxu0 %v832_v58 }
  0xd9   : > { %689 = vmatpush.bf16.msra.mxu2 %v836_v59 }
  0xdc   : > { %v924_v2 = vld [vmem:[#allocation2 + $0x28] sm:$0xf0] }
  0xdd   : > { %v828_v6 = vor.u32 %v924_v2, %v827_v60  ;;  %v923_v4 = vld [vmem:[#allocation2 + $0x20] sm:$0xf0]  ;;  %v821_v7 = vld [vmem:[#allocation2 + $0x24] sm:$0xf0] }
  0xde   : > { %v820_v8 = vor.u32 %v923_v4, %v819_v5  ;;  %v824_v9 = vor.u32 %v922_v51, %v821_v7 }
  0xdf   : > { %716 = vmatpush.bf16.msrb.mxu1 %v828_v6 }
  0xe0   : > { %664 = vmatpush.bf16.msra.mxu0 %v820_v8  ;;  %690 = vmatpush.bf16.msra.mxu2 %v824_v9 }
  0xe3   : > { %717 = vmatpush.bf16.msrb.mxu1 %v816_v11 }
  0xe4   : > { %665 = vmatpush.bf16.msra.mxu0 %v808_v12  ;;  %691 = vmatpush.bf16.msra.mxu2 %v812_v13 }
  0xe6   : > { %718 = vmatmul.bf16.vlgmr.msrb.gmra.mxu1 %v507_v14 }
  0xe7   : > { %666 = vmatmul.bf16.vlgmr.msra.gmra.mxu0 %v507_v14  ;;  %692 = vmatmul.bf16.vlgmr.msra.gmra.mxu2 %v507_v14 }
 0x112   : > { %v502_v21 = vpop.permute.xlu2 %501 }
 0x140   : > { %v680_v15 = vpop.f32.mrf.mxu1 }
 0x146   : > { %v706_v16 = vpop.f32.mrf.mxu3 }
 0x148   : > { %v682_v17 = vpop.f32.mrf.mxu1 }
 0x14e   : > { %v708_v18 = vpop.f32.mrf.mxu3 }
 0x156   : > { %v732_v19 = vpop.f32.mrf.mxu3 }
 0x15e   : > { %v734_v43 = vpop.f32.mrf.mxu3 }
 0x163   : > { %v719_v22 = vpop.f32.mrf.mxu1 }
 0x164   : > { %v720_v24 = vadd.f32 %v719_v22, %v502_v21  ;;  %v667_v25 = vpop.f32.mrf.mxu0 }
 0x165   : > { %v668_v26 = vadd.f32 %v667_v25, %v502_v21 }
 0x166   : > { %v733_v27 = vadd.f32 %v732_v19, %v720_v24 }
 0x167   : > { %v681_v28 = vadd.f32 %v680_v15, %v668_v26 }
 0x168   : > { %v738_v29 = vmax.f32 %v733_v27, 0.0 }
 0x169   : > { %v736_v30 = vmax.f32 %v681_v28, 0.0 }
 0x16a   : > { %741 = vst [vmem:[%s170_s6 + $0x10] sm:$0xff] %v738_v29  ;;  %v693_v33 = vpop.f32.mrf.mxu2 }
 0x16b   : > { %739 = vst [vmem:[%s170_s6] sm:$0xff] %v736_v30  ;;  %v694_v34 = vadd.f32 %v693_v33, %v502_v21  ;;  %v721_v35 = vpop.f32.mrf.mxu1 }
 0x16c   : > { %v669_v23 = vpop.f32.mrf.mxu0 }
 0x16d   : > { %v707_v36 = vadd.f32 %v706_v16, %v694_v34 }
 0x16f   : > { %v737_v37 = vmax.f32 %v707_v36, 0.0 }
 0x171   : > { %740 = vst [vmem:[%s170_s6 + $0x8] sm:$0xff] %v737_v37 }
 0x172   : > { %v695_v38 = vpop.f32.mrf.mxu2 }
 0x173 PF: > { %s13_s12 = sadd.s32 1, %s972_s12  }
 0x174   : > { %p10_p4 = scmp.ge.s32.totalorder %s13_s12, 4  }
 0x176   :  { %12 = sbr.rel (!%p10_p4) target bundleno = 1 (0x1), region = 62 }

</bundles_post_ra>
